<compile_context>
chip_gen: v6e
topology: v6e:2x2x1
jax: 0.10.0
libtpu: 0.0.40
codegen_flags: <defaults>
</compile_context>

<pallas_src>
import jax
import jax.numpy as jnp
from jax.experimental import pallas as pl
from jax.experimental.pallas import tpu as pltpu


def _round_up(a, b):
    return (a + b - 1) // b * b


def _embed_kernel(p_ref, w_ref, pos_ref, out_ref):
    # p_ref:   (TM, Kp)  bf16 row tile of unfolded patches
    # w_ref:   (Kp, Dp)  bf16 projection matrix (grid-invariant)
    # pos_ref: (TM, Dp)  f32  per-row (positional embedding + conv bias)
    # out_ref: (TM, Dp)
    acc = jnp.dot(p_ref[...], w_ref[...], preferred_element_type=jnp.float32)
    out_ref[...] = (acc + pos_ref[...]).astype(out_ref.dtype)


def embedded_patches(x, conv_w, conv_b, cls_token, pos_emb, patch_size):
    """Forward pass of EmbeddedPatches.

    Args:
      x:         (B, C, H, W) input image, NCHW (PyTorch convention).
      conv_w:    (D, C, P, P) Conv2d weight.
      conv_b:    (D,)         Conv2d bias.
      cls_token: (1, 1, D)    class token parameter.
      pos_emb:   (1, N+1, D)  positional embedding parameter.
    Returns:
      (B, N+1, D) embedded sequence.
    """
    B, C, H, W = x.shape
    D = conv_w.shape[0]
    P = patch_size
    Hp, Wp = H // P, W // P
    N = Hp * Wp
    K = C * P * P
    out_dtype = x.dtype

    # ---- layout plumbing (XLA glue): unfold NCHW image into a flat row matrix.
    # (B,C,H,W) -> (B,C,Hp,P,Wp,P) -> (B,Hp,Wp,C,P,P) -> (B*N, C*P*P)
    # Inner order (C, ph, pw) matches Conv2d weight layout.
    # TODO(synk): the unfold transpose is one extra HBM pass; fusing the gather
    # into the kernel's DMA (grid over patch rows with an in-kernel reshape)
    # would remove it but needs an in-kernel cross-lane transpose.
    patches = x.reshape(B, C, Hp, P, Wp, P)
    patches = patches.transpose(0, 2, 4, 1, 3, 5).reshape(B * N, K)
    patches = patches.astype(jnp.bfloat16)

    rows = B * N
    if rows >= 256:
        TM = 256          # v6e/v7x-friendly row tile
    elif rows >= 128:
        TM = 128          # v5e MXU-native row tile
    else:
        TM = _round_up(rows, 8)
    rows_pad = _round_up(rows, TM)
    Kp = _round_up(K, 128)
    Dp = _round_up(D, 128)

    if rows_pad != rows or Kp != K:
        patches = jnp.pad(patches, ((0, rows_pad - rows), (0, Kp - K)))

    # Projection matrix: (D, C*P*P) -> (K, D), bf16, K padded to 128 multiple.
    w_mat = conv_w.reshape(D, K).T.astype(jnp.bfloat16)
    if Kp != K or Dp != D:
        w_mat = jnp.pad(w_mat, ((0, Kp - K), (0, Dp - D)))

    # Fold conv bias into the positional table -> one add inside the kernel.
    pos_body = (pos_emb[0, 1:, :].astype(jnp.float32)
                + conv_b[None, :].astype(jnp.float32))        # (N, D)
    pos_rep = jnp.tile(pos_body, (B, 1))                      # (B*N, D)
    if rows_pad != rows or Dp != D:
        pos_rep = jnp.pad(pos_rep, ((0, rows_pad - rows), (0, Dp - D)))

    grid = (rows_pad // TM,)
    proj = pl.pallas_call(
        _embed_kernel,
        out_shape=jax.ShapeDtypeStruct((rows_pad, Dp), out_dtype),
        grid_spec=pltpu.PrefetchScalarGridSpec(
            num_scalar_prefetch=0,
            grid=grid,
            in_specs=[
                pl.BlockSpec((TM, Kp), lambda i: (i, 0)),     # patch row tile
                pl.BlockSpec((Kp, Dp), lambda i: (0, 0)),     # weight (grid-invariant)
                pl.BlockSpec((TM, Dp), lambda i: (i, 0)),     # pos+bias row tile
            ],
            out_specs=pl.BlockSpec((TM, Dp), lambda i: (i, 0)),
        ),
        compiler_params=pltpu.CompilerParams(
            dimension_semantics=("parallel",)),
    )(patches, w_mat, pos_rep)

    proj = proj[:rows, :D].reshape(B, N, D)

    # cls row = cls_token + pos[0]; prepend with a cheap XLA broadcast + concat.
    cls_row = (cls_token.reshape(1, 1, D).astype(jnp.float32)
               + pos_emb[:, :1, :].astype(jnp.float32)).astype(out_dtype)
    cls_row = jnp.broadcast_to(cls_row, (B, 1, D))
    return jnp.concatenate([cls_row, proj], axis=1)


def _reference(x, conv_w, conv_b, cls_token, pos_emb, patch_size):
    """Pure-JAX f32 reference matching the PyTorch forward."""
    B, C, H, W = x.shape
    D = conv_w.shape[0]
    P = patch_size
    Hp, Wp = H // P, W // P
    N = Hp * Wp
    patches = x.reshape(B, C, Hp, P, Wp, P).transpose(0, 2, 4, 1, 3, 5)
    patches = patches.reshape(B, N, C * P * P)
    proj = patches @ conv_w.reshape(D, -1).T + conv_b[None, None, :]   # (B,N,D)
    cls = jnp.broadcast_to(cls_token, (B, 1, D))
    seq = jnp.concatenate([cls, proj], axis=1)                          # (B,N+1,D)
    return seq + pos_emb


if __name__ == "__main__":
    # Small ViT-style config: 16x16 images, 4x4 patches -> 16 patches, D=128.
    patch_size = 4
    in_channels = 4
    embedded_dim = 128
    H = W = 16
    num_patches = (H // patch_size) * (W // patch_size)  # 16
    batch = 2

    key = jax.random.PRNGKey(0)
    kx, kw, kb, kc, kp = jax.random.split(key, 5)
    x = jax.random.normal(kx, (batch, in_channels, H, W), dtype=jnp.float32)
    conv_w = jax.random.normal(
        kw, (embedded_dim, in_channels, patch_size, patch_size),
        dtype=jnp.float32) * 0.02
    conv_b = jax.random.normal(kb, (embedded_dim,), dtype=jnp.float32) * 0.02
    cls_token = jax.random.normal(kc, (1, 1, embedded_dim), dtype=jnp.float32)
    pos_emb = jax.random.normal(
        kp, (1, num_patches + 1, embedded_dim), dtype=jnp.float32)

    out = embedded_patches(x, conv_w, conv_b, cls_token, pos_emb, patch_size)
    out = jax.block_until_ready(out)

    ref = _reference(x, conv_w, conv_b, cls_token, pos_emb, patch_size)
    assert out.shape == (batch, num_patches + 1, embedded_dim), out.shape
    # Tolerance loosened to cover the bf16 MXU inputs (f32 accumulation).
    assert jnp.allclose(out, ref, atol=2e-2, rtol=2e-2), "mismatch vs reference"

    print("KERNEL_OK")
</pallas_src>

<mosaic_0001>
module attributes {stable_mosaic.version = 11 : i64} {
  func.func @_embed_kernel(%arg0: i32, %arg1: memref<32x128xbf16, #tpu.memory_space<vmem>>, %arg2: memref<128x128xbf16, #tpu.memory_space<vmem>>, %arg3: memref<32x128xf32, #tpu.memory_space<vmem>>, %arg4: memref<32x128xf32, #tpu.memory_space<vmem>>) attributes {dimension_semantics = [#tpu.dimension_semantics<parallel>], iteration_bounds = array<i64: 1>, scalar_prefetch = 0 : i64, scratch_operands = 0 : i64, tpu.core_type = #tpu.core_type<tc>, window_params = [{transform_indices = @transform_0, window_bounds = array<i64: 32, 128>}, {pipeline_mode = #tpu.pipeline_mode<synchronous>, transform_indices = @transform_1, window_bounds = array<i64: 128, 128>}, {transform_indices = @transform_2, window_bounds = array<i64: 32, 128>}, {transform_indices = @transform_3, window_bounds = array<i64: 32, 128>}]} {
    %c0 = arith.constant 0 : index
    %c0_0 = arith.constant 0 : index
    %0 = vector.load %arg1[%c0, %c0_0] : memref<32x128xbf16, #tpu.memory_space<vmem>>, vector<32x128xbf16>
    %c0_1 = arith.constant 0 : index
    %c0_2 = arith.constant 0 : index
    %1 = vector.load %arg2[%c0_1, %c0_2] : memref<128x128xbf16, #tpu.memory_space<vmem>>, vector<128x128xbf16>
    %cst = arith.constant dense<0.000000e+00> : vector<32x128xf32>
    %2 = tpu.matmul %0, %1, %cst {dimension_numbers = #tpu.dot_dimension_numbers<[1], [0], [0], [1], [0, 0, 1, 1], [], []>} : vector<32x128xbf16>, vector<128x128xbf16>, vector<32x128xf32> -> vector<32x128xf32>
    %c0_3 = arith.constant 0 : index
    %c0_4 = arith.constant 0 : index
    %3 = vector.load %arg3[%c0_3, %c0_4] : memref<32x128xf32, #tpu.memory_space<vmem>>, vector<32x128xf32>
    %4 = arith.addf %2, %3 : vector<32x128xf32>
    %c0_5 = arith.constant 0 : index
    %c0_6 = arith.constant 0 : index
    %5 = vector.load %arg4[%c0_5, %c0_6] : memref<32x128xf32, #tpu.memory_space<vmem>>, vector<32x128xf32>
    tpu.vector_store %arg4[%c0_5, %c0_6], %4 {strides = array<i32>} : memref<32x128xf32, #tpu.memory_space<vmem>>, vector<32x128xf32>,
    return
  }
  func.func @transform_0(%arg0: i32) -> (i32, i32) {
    %c0_i32 = arith.constant 0 : i32
    %c0_i32_0 = arith.constant 0 : i32
    return %arg0, %c0_i32 : i32, i32
  }
  func.func @transform_1(%arg0: i32) -> (i32, i32) {
    %c0_i32 = arith.constant 0 : i32
    %c0_i32_0 = arith.constant 0 : i32
    %c0_i32_1 = arith.constant 0 : i32
    return %c0_i32, %c0_i32_0 : i32, i32
  }
  func.func @transform_2(%arg0: i32) -> (i32, i32) {
    %c0_i32 = arith.constant 0 : i32
    %c0_i32_0 = arith.constant 0 : i32
    return %arg0, %c0_i32 : i32, i32
  }
  func.func @transform_3(%arg0: i32) -> (i32, i32) {
    %c0_i32 = arith.constant 0 : i32
    %c0_i32_0 = arith.constant 0 : i32
    return %arg0, %c0_i32 : i32, i32
  }
}

</mosaic_0001>

<bundles_post_ra>
// kernel: tpu_custom_call.1
= control target key start
LH: loop header
LB: loop body
LE: loop exit
PB: predicated region body
PF: predicated region fallthrough
CT: control target
= control target key end

     0   :  { %8 = vsyncpa [#allocation3], 0  ;;  %s402_s0 = inlined_call_operand.hbm [shape: bf16[32,128], index: 0, kind: input, shape index: {}]   ;;  %s403_s1 = inlined_call_operand.hbm [shape: bf16[128,128], index: 1, kind: input, shape index: {}]   ;;  %s404_s2 = inlined_call_operand.hbm [shape: f32[32,128], index: 2, kind: input, shape index: {}]   ;;  %s405_s3 = inlined_call_operand.hbm [shape: f32[32,128], index: 3, kind: output, shape index: {}]  }
   0x1   :  { %9 = vsyncpa [#allocation6], 0 }
   0x2   :  { %10 = vsyncpa [#allocation4], 0  ;;  %s356_s12 = smov [#allocation5]   ;;  %s357_s14 = smov [#allocation2]  }
   0x3   :  { %s28_s13 = sshll.u32 %s356_s12, 4  ;;  %s16_s15 = sshll.u32 %s357_s14, 4  ;;  %s29_s13 = int_to_ptr.vmem [resolvable:$true] %s28_s13  ;;  %s17_s15 = int_to_ptr.vmem [resolvable:$true] %s16_s15 }
   0x4   :  { %s278_s16 = scalar_lea.vmem %s29_s13, 1024  ;;  %p283_p1 = scmp.lt.s32.totalorder %s29_s13, %s29_s13 }
   0x5   :  { %p279_p0 = scmp.ne.s32.totalorder %s29_s13, %s278_s16  ;;  %p284_p2 = scmp.lt.s32.totalorder %s278_s16, %s278_s16 }
   0x7   :  { %p285_p3 = por %p284_p2, %p283_p1 }
   0x9   :  { %p286_p4 = pnand %p285_p3, %p279_p0 }
   0xb   :  { %289 = shalt.err (!%p286_p4)
}
   0xc   :  { %s358_s17 = smov 64   ;;  %s359_s18 = smov 4  }
   0xd   :  { %34 = dma.hbm_to_vmem [thread:$0]  %s403_s1, 1024, %s29_s13, [#allocation6], %s358_s17, %s358_s17, %s359_s18  }
   0xe   :  { %s298_s21 = scalar_lea.vmem %s17_s15, 256  ;;  %p303_p6 = scmp.lt.s32.totalorder %s17_s15, %s17_s15 }
   0xf   :  { %p299_p5 = scmp.ne.s32.totalorder %s17_s15, %s298_s21  ;;  %p304_p7 = scmp.lt.s32.totalorder %s298_s21, %s298_s21 }
  0x11   :  { %p305_p8 = por %p304_p7, %p303_p6 }
  0x13   :  { %p306_p9 = pnand %p305_p8, %p299_p5 }
  0x15   :  { %309 = shalt.err (!%p306_p9)
}
  0x16   :  { %22 = dma.hbm_to_vmem [thread:$0]  %s402_s0, 256, %s17_s15, [#allocation3], %s358_s17, %s358_s17, %s359_s18  }
  0x17   :  { %s360_s24 = smov [#allocation7]  }
  0x18   :  { %s40_s25 = sshll.u32 %s360_s24, 4  ;;  %s41_s25 = int_to_ptr.vmem [resolvable:$true] %s40_s25 }
  0x19   :  { %s318_s26 = scalar_lea.vmem %s41_s25, 512  ;;  %p323_p11 = scmp.lt.s32.totalorder %s41_s25, %s41_s25 }
  0x1a   :  { %p319_p10 = scmp.ne.s32.totalorder %s41_s25, %s318_s26  ;;  %p324_p12 = scmp.lt.s32.totalorder %s318_s26, %s318_s26 }
  0x1c   :  { %p325_p13 = por %p324_p12, %p323_p11 }
  0x1e   :  { %p326_p0 = pnand %p325_p13, %p319_p10 }
  0x20   :  { %329 = shalt.err (!%p326_p0)
}
  0x21   :  { %s361_s1 = smov 128   ;;  %s362_s27 = smov 8  }
  0x22   :  { %46 = dma.hbm_to_vmem [thread:$0]  %s404_s2, 512, %s41_s25, [#allocation6], %s361_s1, %s361_s1, %s362_s27  }
  0x23   :  { %350 = dma.done.wait [#allocation3], 256  }
  0x24   :  { %351 = vsyncadd [#allocation3], 4294967040 }
  0x25   :  { %352 = dma.done.wait [#allocation6], 1536  }
  0x26   :  { %353 = vsyncadd [#allocation6], 4294965760  ;;  %v260_v0 = vld [vmem:[#allocation5 + $0x38] sm:$0xff]   ;;  %v261_v1 = vld [vmem:[#allocation5 + $0x30] sm:$0xff]   ;;  %s363_s0 = smov [#allocation8]  }
  0x27   :  { %232 = vmatprep.subr.bf16.mxu0 %v260_v0  ;;  %v262_v2 = vld [vmem:[#allocation5 + $0x28] sm:$0xff]   ;;  %v263_v3 = vld [vmem:[#allocation5 + $0x20] sm:$0xff]   ;;  %v268_v4 = vld [vmem:[#allocation2] sm:$0xff]   ;;  %s199_s2 = sshll.u32 %s363_s0, 4  ;;  %s200_s2 = int_to_ptr.vmem [resolvable:$true] %s199_s2 }
  0x28   :  { %233 = vmatpush3.bf16.msra.mxu0 %v260_v0  ;;  %248 = vmatprep.mubr.bf16.mxu0 %v268_v4  ;;  %v264_v5 = vld [vmem:[#allocation5 + $0x18] sm:$0xff]   ;;  %v265_v6 = vld [vmem:[#allocation5 + $0x10] sm:$0xff]   ;;  %v266_v7 = vld [vmem:[#allocation5 + $0x8] sm:$0xff]   ;;  %s330_s30 = scalar_lea.vmem %s200_s2, 512  ;;  %p335_p2 = scmp.lt.s32.totalorder %s200_s2, %s200_s2 }
  0x29   :  { %234 = vmatprep.subr.bf16.mxu0 %v261_v1  ;;  %v267_v8 = vld [vmem:[#allocation5] sm:$0xff]   ;;  %v269_v9 = vld [vmem:[#allocation2 + $0x8] sm:$0xff]   ;;  %v79_v10 = vld [vmem:[#allocation7 + $0x10] sm:$0xff]  ;;  %p331_p1 = scmp.ne.s32.totalorder %s200_s2, %s330_s30  ;;  %p336_p3 = scmp.lt.s32.totalorder %s330_s30, %s330_s30 }
  0x2a   :  { %v77_v12 = vld [vmem:[#allocation7] sm:$0xff]  ;;  %v80_v15 = vld [vmem:[#allocation7 + $0x18] sm:$0xff]  ;;  %v78_v18 = vld [vmem:[#allocation7 + $0x8] sm:$0xff] }
  0x2b   :  { %p337_p4 = por %p336_p3, %p335_p2 }
  0x2c   :  { %235 = vmatpush3.bf16.msra.mxu0 %v261_v1 }
  0x2d   :  { %236 = vmatprep.subr.bf16.mxu0 %v262_v2  ;;  %p338_p5 = pnand %p337_p4, %p331_p1 }
  0x30   :  { %237 = vmatpush3.bf16.msra.mxu0 %v262_v2 }
  0x31   :  { %238 = vmatprep.subr.bf16.mxu0 %v263_v3 }
  0x34   :  { %239 = vmatpush3.bf16.msra.mxu0 %v263_v3 }
  0x35   :  { %240 = vmatprep.subr.bf16.mxu0 %v264_v5 }
  0x38   :  { %241 = vmatpush3.bf16.msra.mxu0 %v264_v5 }
  0x39   :  { %242 = vmatprep.subr.bf16.mxu0 %v265_v6 }
  0x3c   :  { %243 = vmatpush3.bf16.msra.mxu0 %v265_v6 }
  0x3d   :  { %244 = vmatprep.subr.bf16.mxu0 %v266_v7 }
  0x40   :  { %245 = vmatpush3.bf16.msra.mxu0 %v266_v7 }
  0x41   :  { %246 = vmatprep.subr.bf16.mxu0 %v267_v8 }
  0x44   :  { %247 = vmatpush3.bf16.msra.mxu0 %v267_v8 }
  0x47   :  { %249 = vmatmul.mubr.bf16.vlgmr.msra.gmra.mxu0 %v269_v9 }
 0x107   :  { %v250_v11 = vpop.f32.mrf.mxu0 }
 0x108   :  { %v184_v13 = vadd.f32 %v250_v11, %v79_v10 }
 0x109   :  { %v175_v14 = vpop.f32.mrf.mxu0 }
 0x10a   :  { %192 = vst [vmem:[#allocation8 + $0x10] sm:$0xff] %v184_v13  ;;  %v176_v16 = vadd.f32 %v175_v14, %v77_v12 }
 0x10b   :  { %v251_v17 = vpop.f32.mrf.mxu0 }
 0x10c   :  { %190 = vst [vmem:[#allocation8] sm:$0xff] %v176_v16  ;;  %v187_v19 = vadd.f32 %v251_v17, %v80_v15 }
 0x10d   :  { %v178_v20 = vpop.f32.mrf.mxu0 }
 0x10e   :  { %193 = vst [vmem:[#allocation8 + $0x18] sm:$0xff] %v187_v19  ;;  %v179_v21 = vadd.f32 %v178_v20, %v78_v18 }
 0x110   :  { %191 = vst [vmem:[#allocation8 + $0x8] sm:$0xff] %v179_v21 }
 0x111   :  { %341 = shalt.err (!%p338_p5)
}
 0x112   :  { %205 = dma.vmem_to_hbm [thread:$0]  %s200_s2, 512, %s405_s3, [#allocation4], %s361_s1, %s361_s1, %s362_s27  }
 0x113   :  { %354 = dma.done.wait [#allocation4], 512  }
 0x114   :  { %355 = vsyncadd [#allocation4], 4294966784 }
 0x115   :  { %209 = vsyncpa [#allocation3], 1 }
 0x116   :  { %210 = vsyncpa [#allocation6], 1 }
 0x117   :  { %211 = vsyncpa [#allocation4], 1 }

</bundles_post_ra>
